<compile_context>
chip_gen: v7x
topology: tpu7x:2x2x1
jax: 0.10.0
libtpu: 0.0.40
codegen_flags: <defaults>
</compile_context>

<pallas_src>
import functools

import jax
import jax.numpy as jnp
from jax import lax
from jax.experimental import pallas as pl
from jax.experimental.pallas import tpu as pltpu

# "cfg" constants (deterministic, in-script).
POS_RADIUS = 0.7   # cfg.loss.saliency_loss.positive_radius
WEIGHT = 1.0       # cfg.loss.saliency_loss.weight
EPS = 1e-12
_BIG = 1.0e30      # finite masking magnitude (avoids inf/NaN arithmetic)
_NEG_INIT = -3.0e38  # online-argmax carry init


def _round_up(x, m):
    return ((x + m - 1) // m) * m


def _bce(scores, labels):
    # torch.nn.functional.binary_cross_entropy clamps the log terms at -100.
    log_s = jnp.maximum(jnp.log(scores), -100.0)
    log_1ms = jnp.maximum(jnp.log(1.0 - scores), -100.0)
    return -(labels * log_s + (1.0 - labels) * log_1ms)


def _vmem_capacity_bytes():
    # Trace-time hardware query; fall back to the smallest per-core VMEM (v7x: 64 MiB).
    try:
        cap = int(getattr(pltpu.get_tpu_info(), "vmem_capacity_bytes", 0))
        if cap > 0:
            return cap
    except Exception:
        pass
    return 64 * 1024 * 1024


def _pick_tile_m(n_pad, c_aug, n_tgt, vmem_budget):
    """Largest lane-aligned M tile whose live temporaries + pipeline buffers fit the budget."""
    upper = _round_up(max(n_tgt, 128), 128)
    chosen = 128
    for cand in (2048, 1024, 512, 256, 128):
        cand = min(cand, upper)
        live = 5 * n_pad * cand * 4                               # sim, d2, tie-select temps (f32)
        stream = 2 * (cand * c_aug * 2 + 8 * cand * 4 + cand * 4)  # double-buffered tgt tiles
        resident = 2 * (n_pad * c_aug * 2 + n_pad * 8 * 4)         # resident src blocks (2 bufs)
        outs = 2 * (2 * n_pad * 4 + 8 * cand * 4)                  # carry / accumulator outputs
        if live + stream + resident + outs <= vmem_budget:
            chosen = cand
            break
    return min(chosen, upper)


def _saliency_kernel(src_feats_ref, tgt_feats_ref, src_pts_ref, tgt_pts_ref,
                     tgt_scores_ref,
                     best_sim_ref, best_d2_ref, tacc_ref,
                     *, pos_radius2):
    f32 = jnp.float32
    j = pl.program_id(1)  # tile index within this slab (the "arbitrary" axis)

    @pl.when(j == 0)
    def _init():
        best_sim_ref[...] = jnp.full_like(best_sim_ref, _NEG_INIT)
        best_d2_ref[...] = jnp.full_like(best_d2_ref, _BIG)
        tacc_ref[...] = jnp.zeros_like(tacc_ref)

    # Similarity with validity masking folded into the bf16 feature matmul (f32 acc):
    # src rows carry [feats | row_bias | 1], tgt rows carry [feats | 1 | col_bias], so
    # sim = <f_s, f_t> + row_bias + col_bias in a single MXU pass, no VPU masking passes.
    sim = lax.dot_general(src_feats_ref[...], tgt_feats_ref[...],
                          dimension_numbers=(((1,), (1,)), ((), ())),
                          preferred_element_type=f32)               # (n_pad, tile_m)

    # Pairwise squared distances via the Gram identity, also a single MXU pass:
    # src rows carry [p, |p|^2, 1, 0..], tgt cols carry [-2q; 1; |q|^2 (+BIG if padded)].
    d2 = lax.dot_general(src_pts_ref[...], tgt_pts_ref[...],
                         dimension_numbers=(((1,), (0,)), ((), ())),
                         precision=lax.Precision.HIGHEST,
                         preferred_element_type=f32)                # (n_pad, tile_m)

    # --- src side: online (streaming) argmax carry over this slab's M tiles.
    # Distance at the argmax is extracted as min(d2 | sim == row_max): on exact float ties
    # this picks the smallest distance among tied maxima (torch picks the first index).
    row_max = jnp.max(sim, axis=1, keepdims=True)                   # (n_pad, 1)
    row_d2 = jnp.min(jnp.where(sim == row_max, d2, _BIG), axis=1, keepdims=True)
    better = row_max > best_sim_ref[...]         # strict >: earlier tile wins ties
    best_d2_ref[...] = jnp.where(better, row_d2, best_d2_ref[...])
    best_sim_ref[...] = jnp.where(better, row_max, best_sim_ref[...])

    # --- tgt side: column argmax is complete within the tile (all src rows resident).
    col_max = jnp.max(sim, axis=0, keepdims=True)                   # (1, tile_m)
    tgt_d2 = jnp.min(jnp.where(sim == col_max, d2, _BIG), axis=0, keepdims=True)
    tgt_labels = (tgt_d2 < pos_radius2).astype(f32)                 # padded cols -> 0 (d2 ~ BIG)
    tgt_scores = tgt_scores_ref[...]                                # (1, tile_m), zero padded
    tgt_bce = _bce(tgt_scores, tgt_labels)                          # padded cols -> 0
    tgt_tp = jnp.where(tgt_scores > 0.5, tgt_labels, 0.0)           # pred * label

    # Lane-dense partial sums, accumulated with one full (8, tile_m) read-modify-write.
    pad_rows = tacc_ref.shape[0] - 4
    upd = jnp.concatenate(
        [tgt_labels, tgt_bce, tgt_labels * tgt_bce, tgt_tp,
         jnp.zeros((pad_rows, tgt_labels.shape[1]), f32)], axis=0)  # (8, tile_m)
    tacc_ref[...] = tacc_ref[...] + upd


def saliency_loss(data_dict, output_dict, pos_radius=POS_RADIUS, weight=WEIGHT):
    src_corr_indices = data_dict['src_corr_indices']
    tgt_corr_indices = data_dict['tgt_corr_indices']
    transform = data_dict['transform'].astype(jnp.float32)
    src_points = output_dict['src_points'].astype(jnp.float32)
    tgt_points = output_dict['tgt_points'].astype(jnp.float32)
    src_scores = output_dict['src_saliency_scores'].astype(jnp.float32)
    tgt_scores = output_dict['tgt_saliency_scores'].astype(jnp.float32)
    src_feats = output_dict['src_feats']
    tgt_feats = output_dict['tgt_feats']

    # TODO(synk): torch.unique has a data-dependent output size; the correspondence index
    # sets are duplicate-free upstream, so a fixed-size jnp.unique (size = #corr) is exact.
    src_pos_indices = jnp.unique(src_corr_indices, size=src_corr_indices.shape[0])
    tgt_pos_indices = jnp.unique(tgt_corr_indices, size=tgt_corr_indices.shape[0])

    n_src = int(src_pos_indices.shape[0])
    n_tgt = int(tgt_pos_indices.shape[0])

    # Rigid transform (K=3 matmul) and gathers stay in XLA — worst possible MXU shapes.
    rot = transform[:3, :3]
    trans = transform[:3, 3]
    src_pos_points = src_points[src_pos_indices] @ rot.T + trans          # (N, 3)
    tgt_pos_points = tgt_points[tgt_pos_indices]                          # (M, 3)

    src_pos_feats = src_feats[src_pos_indices].astype(jnp.float32)        # (N, C)
    tgt_pos_feats = tgt_feats[tgt_pos_indices].astype(jnp.float32)        # (M, C)
    src_pos_scores = src_scores[src_pos_indices]                          # (N,)
    tgt_pos_scores = tgt_scores[tgt_pos_indices]                          # (M,)
    feat_dim = int(src_pos_feats.shape[1])
    c_aug = feat_dim + 2

    # ---- padding / tiling ------------------------------------------------------------
    n_pad = _round_up(max(n_src, 16), 16)
    vmem_cap = _vmem_capacity_bytes()
    vmem_limit = max(32 << 20, min(int(vmem_cap * 0.8), 100 << 20))
    tile_m = _pick_tile_m(n_pad, c_aug, n_tgt, vmem_limit - (8 << 20))
    num_tiles = (max(n_tgt, 1) + tile_m - 1) // tile_m
    # Split the M tiles into slabs on a leading "parallel" grid axis: on v7x the slabs map
    # onto both TensorCores (≈2x on the VPU-bound loop); on 1-TC chips they serialize.
    n_split = 2 if num_tiles >= 2 else 1
    tiles_per_split = _round_up(num_tiles, n_split) // n_split
    m_pad = n_split * tiles_per_split * tile_m

    row_valid = jnp.arange(n_pad) < n_src
    col_valid = jnp.arange(m_pad) < n_tgt

    # Features with masking folded in: src = [feats | row_bias | 1], tgt = [feats | 1 | col_bias],
    # biases are 0 (valid) / -BIG (padding). bf16 halves bytes; MXU accumulates in f32.
    src_feats_aug = jnp.zeros((n_pad, c_aug), jnp.float32)
    src_feats_aug = src_feats_aug.at[:n_src, :feat_dim].set(src_pos_feats)
    src_feats_aug = src_feats_aug.at[:, feat_dim].set(jnp.where(row_valid, 0.0, -_BIG))
    src_feats_aug = src_feats_aug.at[:, feat_dim + 1].set(1.0)
    src_feats_aug = src_feats_aug.astype(jnp.bfloat16)

    tgt_feats_aug = jnp.zeros((m_pad, c_aug), jnp.float32)
    tgt_feats_aug = tgt_feats_aug.at[:n_tgt, :feat_dim].set(tgt_pos_feats)
    tgt_feats_aug = tgt_feats_aug.at[:, feat_dim].set(1.0)
    tgt_feats_aug = tgt_feats_aug.at[:, feat_dim + 1].set(jnp.where(col_valid, 0.0, -_BIG))
    tgt_feats_aug = tgt_feats_aug.astype(jnp.bfloat16)

    # Gram-augmented points: d2[n, m] = |p_n|^2 + |q_m|^2 - 2 p_n . q_m as a single matmul.
    src_pts_aug = jnp.zeros((n_pad, 8), jnp.float32)
    src_pts_aug = src_pts_aug.at[:n_src, 0:3].set(src_pos_points)
    src_pts_aug = src_pts_aug.at[:n_src, 3].set(jnp.sum(src_pos_points ** 2, axis=1))
    src_pts_aug = src_pts_aug.at[:, 4].set(1.0)

    tgt_pts_aug = jnp.zeros((8, m_pad), jnp.float32)
    tgt_pts_aug = tgt_pts_aug.at[0:3, :n_tgt].set(-2.0 * tgt_pos_points.T)
    tgt_pts_aug = tgt_pts_aug.at[3, :n_tgt].set(1.0)
    tgt_norm2 = jnp.full((m_pad,), _BIG, jnp.float32)
    tgt_norm2 = tgt_norm2.at[:n_tgt].set(jnp.sum(tgt_pos_points ** 2, axis=1))
    tgt_pts_aug = tgt_pts_aug.at[4, :].set(tgt_norm2)                     # padded cols -> +BIG

    tgt_scores_p = jnp.zeros((1, m_pad), jnp.float32).at[0, :n_tgt].set(tgt_pos_scores)

    kernel = functools.partial(_saliency_kernel, pos_radius2=float(pos_radius) ** 2)

    # TODO(synk): the constant-index resident blocks (src feats / src pts) could be
    # single-buffered via pipeline_mode=pl.Buffered(1); left at the default for lowering
    # robustness — the double buffer is accounted for in the tile_m VMEM budget instead.
    best_sim, best_d2, tacc = pl.pallas_call(
        kernel,
        out_shape=(
            jax.ShapeDtypeStruct((n_split, n_pad, 1), jnp.float32),   # per-slab best sim
            jax.ShapeDtypeStruct((n_split, n_pad, 1), jnp.float32),   # d2 at that argmax
            jax.ShapeDtypeStruct((n_split, 8, tile_m), jnp.float32),  # lane-dense tgt sums
        ),
        grid_spec=pltpu.PrefetchScalarGridSpec(
            num_scalar_prefetch=0,
            grid=(n_split, tiles_per_split),
            in_specs=[
                pl.BlockSpec((n_pad, c_aug), lambda c, j: (0, 0)),                    # src feats
                pl.BlockSpec((tile_m, c_aug), lambda c, j: (c * tiles_per_split + j, 0)),
                pl.BlockSpec((n_pad, 8), lambda c, j: (0, 0)),                        # src pts
                pl.BlockSpec((8, tile_m), lambda c, j: (0, c * tiles_per_split + j)),
                pl.BlockSpec((1, tile_m), lambda c, j: (0, c * tiles_per_split + j)),
            ],
            out_specs=(
                pl.BlockSpec((None, n_pad, 1), lambda c, j: (c, 0, 0)),
                pl.BlockSpec((None, n_pad, 1), lambda c, j: (c, 0, 0)),
                pl.BlockSpec((None, 8, tile_m), lambda c, j: (c, 0, 0)),
            ),
        ),
        compiler_params=pltpu.CompilerParams(
            dimension_semantics=("parallel", "arbitrary"),
            vmem_limit_bytes=vmem_limit,
        ),
    )(src_feats_aug, tgt_feats_aug, src_pts_aug, tgt_pts_aug, tgt_scores_p)

    # ---- tiny XLA epilogue: combine per-slab carries and finish the scalar loss -------
    f32 = jnp.float32
    bs = best_sim[:, :n_src, 0]                                      # (n_split, N)
    bd = best_d2[:, :n_src, 0]
    core = jnp.argmax(bs, axis=0)                                    # first max -> lower slab wins ties
    nn_d2 = jnp.take_along_axis(bd, core[None, :], axis=0)[0]        # (N,)
    # TODO(synk): src-side carry/epilogue stays in (N, 1)-style column layout; lane-
    # densifying it needs an in-kernel transpose of the online-argmax carry (skipped).
    src_labels = (nn_d2 < float(pos_radius) ** 2).astype(f32)
    src_bce = _bce(src_pos_scores, src_labels)
    src_pred = (src_pos_scores > 0.5).astype(f32)

    tsum = jnp.sum(tacc, axis=(0, 2))                                # (8,) slab+lane reduce
    pos_cnt = jnp.sum(src_labels) + tsum[0]
    bce_sum = jnp.sum(src_bce) + tsum[1]
    pos_bce = jnp.sum(src_labels * src_bce) + tsum[2]
    tp = jnp.sum(src_pred * src_labels) + tsum[3]
    pred_cnt = jnp.sum(src_pred) + jnp.sum((tgt_pos_scores > 0.5).astype(f32))
    neg_bce = bce_sum - pos_bce

    total = jnp.float32(n_src + n_tgt)
    w_neg = pos_cnt / total
    w_pos = 1.0 - w_neg
    # mean(weight * bce) = (w_pos * sum(label*bce) + w_neg * sum((1-label)*bce)) / total
    loss = ((w_pos * pos_bce + w_neg * neg_bce) / total) * weight
    precision = tp / (pred_cnt + EPS)
    recall = tp / (pos_cnt + EPS)
    return loss, precision, recall


def _make_transform(angle, translation):
    c, s = jnp.cos(angle), jnp.sin(angle)
    rot = jnp.array([[c, -s, 0.0],
                     [s,  c, 0.0],
                     [0.0, 0.0, 1.0]], dtype=jnp.float32)
    t = jnp.asarray(translation, dtype=jnp.float32)
    top = jnp.concatenate([rot, t.reshape(3, 1)], axis=1)
    bottom = jnp.array([[0.0, 0.0, 0.0, 1.0]], dtype=jnp.float32)
    return jnp.concatenate([top, bottom], axis=0)


if __name__ == "__main__":
    key = jax.random.PRNGKey(0)
    k = jax.random.split(key, 10)

    n_src, n_tgt, feat_dim = 24, 20, 32
    n_src_corr, n_tgt_corr = 12, 10

    src_points = jax.random.uniform(k[0], (n_src, 3), dtype=jnp.float32)
    tgt_points = jax.random.uniform(k[1], (n_tgt, 3), dtype=jnp.float32)
    src_feats = jax.random.normal(k[2], (n_src, feat_dim), dtype=jnp.float32)
    tgt_feats = jax.random.normal(k[3], (n_tgt, feat_dim), dtype=jnp.float32)
    # saliency scores are probabilities in (0, 1)
    src_saliency_scores = jax.random.uniform(k[4], (n_src,), dtype=jnp.float32,
                                             minval=0.01, maxval=0.99)
    tgt_saliency_scores = jax.random.uniform(k[5], (n_tgt,), dtype=jnp.float32,
                                             minval=0.01, maxval=0.99)

    # duplicate-free correspondence indices (so fixed-size unique is exact)
    src_corr_indices = jax.random.permutation(k[6], n_src)[:n_src_corr].astype(jnp.int32)
    tgt_corr_indices = jax.random.permutation(k[7], n_tgt)[:n_tgt_corr].astype(jnp.int32)

    transform = _make_transform(0.3, [0.1, -0.2, 0.05])

    data_dict = {
        'src_corr_indices': src_corr_indices,
        'tgt_corr_indices': tgt_corr_indices,
        'transform': transform,
    }
    output_dict = {
        'src_points': src_points,
        'tgt_points': tgt_points,
        'src_saliency_scores': src_saliency_scores,
        'tgt_saliency_scores': tgt_saliency_scores,
        'src_feats': src_feats,
        'tgt_feats': tgt_feats,
    }

    loss, precision, recall = saliency_loss(data_dict, output_dict)
    jax.block_until_ready((loss, precision, recall))
    print("KERNEL_OK")
</pallas_src>

<mosaic_0001>
module attributes {stable_mosaic.version = 11 : i64} {
  func.func @_saliency_kernel(%arg0: i32, %arg1: i32, %arg2: memref<16x34xbf16, #tpu.memory_space<vmem>>, %arg3: memref<128x34xbf16, #tpu.memory_space<vmem>>, %arg4: memref<16x8xf32, #tpu.memory_space<vmem>>, %arg5: memref<8x128xf32, #tpu.memory_space<vmem>>, %arg6: memref<1x128xf32, #tpu.memory_space<vmem>>, %arg7: memref<1x16x1xf32, #tpu.memory_space<vmem>>, %arg8: memref<1x16x1xf32, #tpu.memory_space<vmem>>, %arg9: memref<1x8x128xf32, #tpu.memory_space<vmem>>) attributes {dimension_semantics = [#tpu.dimension_semantics<parallel>, #tpu.dimension_semantics<arbitrary>], iteration_bounds = array<i64: 1, 1>, scalar_prefetch = 0 : i64, scratch_operands = 0 : i64, tpu.core_type = #tpu.core_type<tc>, window_params = [{pipeline_mode = #tpu.pipeline_mode<synchronous>, transform_indices = @transform_0, window_bounds = array<i64: 16, 34>}, {transform_indices = @transform_1, window_bounds = array<i64: 128, 34>}, {pipeline_mode = #tpu.pipeline_mode<synchronous>, transform_indices = @transform_2, window_bounds = array<i64: 16, 8>}, {transform_indices = @transform_3, window_bounds = array<i64: 8, 128>}, {transform_indices = @transform_4, window_bounds = array<i64: 1, 128>}, {transform_indices = @transform_5, window_bounds = array<i64: 1, 16, 1>}, {transform_indices = @transform_6, window_bounds = array<i64: 1, 16, 1>}, {transform_indices = @transform_7, window_bounds = array<i64: 1, 8, 128>}]} {
    %c0_i32 = arith.constant 0 : i32
    %0 = arith.cmpi eq, %arg1, %c0_i32 : i32
    %1 = arith.extui %0 : i1 to i32
    %c0_i32_0 = arith.constant 0 : i32
    %2 = arith.cmpi ne, %1, %c0_i32_0 : i32
    scf.if %2 {
      %cst_47 = arith.constant -3.000000e+38 : f32
      %73 = vector.broadcast %cst_47 : f32 to vector<16x1xf32>
      %c0_48 = arith.constant 0 : index
      %c0_49 = arith.constant 0 : index
      %c0_50 = arith.constant 0 : index
      %74 = vector.load %arg7[%c0_48, %c0_49, %c0_50] : memref<1x16x1xf32, #tpu.memory_space<vmem>>, vector<1x16x1xf32>
      %75 = vector.shape_cast %74 : vector<1x16x1xf32> to vector<16x1xf32>
      %76 = vector.shape_cast %73 : vector<16x1xf32> to vector<1x16x1xf32>
      tpu.vector_store %arg7[%c0_48, %c0_49, %c0_50], %76 {strides = array<i32>} : memref<1x16x1xf32, #tpu.memory_space<vmem>>, vector<1x16x1xf32>,
      %cst_51 = arith.constant 1.000000e+30 : f32
      %77 = vector.broadcast %cst_51 : f32 to vector<16x1xf32>
      %c0_52 = arith.constant 0 : index
      %c0_53 = arith.constant 0 : index
      %c0_54 = arith.constant 0 : index
      %78 = vector.load %arg8[%c0_52, %c0_53, %c0_54] : memref<1x16x1xf32, #tpu.memory_space<vmem>>, vector<1x16x1xf32>
      %79 = vector.shape_cast %78 : vector<1x16x1xf32> to vector<16x1xf32>
      %80 = vector.shape_cast %77 : vector<16x1xf32> to vector<1x16x1xf32>
      tpu.vector_store %arg8[%c0_52, %c0_53, %c0_54], %80 {strides = array<i32>} : memref<1x16x1xf32, #tpu.memory_space<vmem>>, vector<1x16x1xf32>,
      %cst_55 = arith.constant 0.000000e+00 : f32
      %81 = vector.broadcast %cst_55 : f32 to vector<8x128xf32>
      %c0_56 = arith.constant 0 : index
      %c0_57 = arith.constant 0 : index
      %c0_58 = arith.constant 0 : index
      %82 = vector.load %arg9[%c0_56, %c0_57, %c0_58] : memref<1x8x128xf32, #tpu.memory_space<vmem>>, vector<1x8x128xf32>
      %83 = vector.shape_cast %82 : vector<1x8x128xf32> to vector<8x128xf32>
      %84 = vector.shape_cast %81 : vector<8x128xf32> to vector<1x8x128xf32>
      tpu.vector_store %arg9[%c0_56, %c0_57, %c0_58], %84 {strides = array<i32>} : memref<1x8x128xf32, #tpu.memory_space<vmem>>, vector<1x8x128xf32>,
    } else {
    }
    %c0 = arith.constant 0 : index
    %c0_1 = arith.constant 0 : index
    %3 = vector.load %arg2[%c0, %c0_1] : memref<16x34xbf16, #tpu.memory_space<vmem>>, vector<16x34xbf16>
    %c0_2 = arith.constant 0 : index
    %c0_3 = arith.constant 0 : index
    %4 = vector.load %arg3[%c0_2, %c0_3] : memref<128x34xbf16, #tpu.memory_space<vmem>>, vector<128x34xbf16>
    %cst = arith.constant dense<0.000000e+00> : vector<16x128xf32>
    %5 = tpu.matmul %3, %4, %cst {dimension_numbers = #tpu.dot_dimension_numbers<[1], [1], [0], [0], [0, 0, 1, 0], [], []>} : vector<16x34xbf16>, vector<128x34xbf16>, vector<16x128xf32> -> vector<16x128xf32>
    %c0_4 = arith.constant 0 : index
    %c0_5 = arith.constant 0 : index
    %6 = vector.load %arg4[%c0_4, %c0_5] : memref<16x8xf32, #tpu.memory_space<vmem>>, vector<16x8xf32>
    %c0_6 = arith.constant 0 : index
    %c0_7 = arith.constant 0 : index
    %7 = vector.load %arg5[%c0_6, %c0_7] : memref<8x128xf32, #tpu.memory_space<vmem>>, vector<8x128xf32>
    %cst_8 = arith.constant dense<0.000000e+00> : vector<16x128xf32>
    %8 = tpu.matmul %6, %7, %cst_8 {dimension_numbers = #tpu.dot_dimension_numbers<[1], [0], [0], [1], [0, 0, 1, 1], [], []>, precision = #tpu.contract_precision<fp32>} : vector<16x8xf32>, vector<8x128xf32>, vector<16x128xf32> -> vector<16x128xf32>
    %cst_9 = arith.constant dense<0xFF800000> : vector<16xf32>
    %9 = vector.multi_reduction <maximumf>, %5, %cst_9 [1] : vector<16x128xf32> to vector<16xf32>
    %10 = vector.shape_cast %9 : vector<16xf32> to vector<16x1xf32>
    %11 = vector.broadcast %10 : vector<16x1xf32> to vector<16x128xf32>
    %12 = arith.cmpf oeq, %5, %11 : vector<16x128xf32>
    %cst_10 = arith.constant 1.000000e+30 : f32
    %13 = vector.broadcast %cst_10 : f32 to vector<16x128xf32>
    %14 = arith.select %12, %8, %13 : vector<16x128xi1>, vector<16x128xf32>
    %cst_11 = arith.constant dense<0x7F800000> : vector<16xf32>
    %15 = vector.multi_reduction <minimumf>, %14, %cst_11 [1] : vector<16x128xf32> to vector<16xf32>
    %16 = vector.shape_cast %15 : vector<16xf32> to vector<16x1xf32>
    %c0_12 = arith.constant 0 : index
    %c0_13 = arith.constant 0 : index
    %c0_14 = arith.constant 0 : index
    %17 = vector.load %arg7[%c0_12, %c0_13, %c0_14] : memref<1x16x1xf32, #tpu.memory_space<vmem>>, vector<1x16x1xf32>
    %18 = vector.shape_cast %17 : vector<1x16x1xf32> to vector<16x1xf32>
    %19 = arith.cmpf ogt, %10, %18 : vector<16x1xf32>
    %c0_15 = arith.constant 0 : index
    %c0_16 = arith.constant 0 : index
    %c0_17 = arith.constant 0 : index
    %20 = vector.load %arg8[%c0_15, %c0_16, %c0_17] : memref<1x16x1xf32, #tpu.memory_space<vmem>>, vector<1x16x1xf32>
    %21 = vector.shape_cast %20 : vector<1x16x1xf32> to vector<16x1xf32>
    %22 = arith.select %19, %16, %21 : vector<16x1xi1>, vector<16x1xf32>
    %c0_18 = arith.constant 0 : index
    %c0_19 = arith.constant 0 : index
    %c0_20 = arith.constant 0 : index
    %23 = vector.load %arg8[%c0_18, %c0_19, %c0_20] : memref<1x16x1xf32, #tpu.memory_space<vmem>>, vector<1x16x1xf32>
    %24 = vector.shape_cast %23 : vector<1x16x1xf32> to vector<16x1xf32>
    %25 = vector.shape_cast %22 : vector<16x1xf32> to vector<1x16x1xf32>
    tpu.vector_store %arg8[%c0_18, %c0_19, %c0_20], %25 {strides = array<i32>} : memref<1x16x1xf32, #tpu.memory_space<vmem>>, vector<1x16x1xf32>,
    %c0_21 = arith.constant 0 : index
    %c0_22 = arith.constant 0 : index
    %c0_23 = arith.constant 0 : index
    %26 = vector.load %arg7[%c0_21, %c0_22, %c0_23] : memref<1x16x1xf32, #tpu.memory_space<vmem>>, vector<1x16x1xf32>
    %27 = vector.shape_cast %26 : vector<1x16x1xf32> to vector<16x1xf32>
    %28 = arith.select %19, %10, %27 : vector<16x1xi1>, vector<16x1xf32>
    %c0_24 = arith.constant 0 : index
    %c0_25 = arith.constant 0 : index
    %c0_26 = arith.constant 0 : index
    %29 = vector.load %arg7[%c0_24, %c0_25, %c0_26] : memref<1x16x1xf32, #tpu.memory_space<vmem>>, vector<1x16x1xf32>
    %30 = vector.shape_cast %29 : vector<1x16x1xf32> to vector<16x1xf32>
    %31 = vector.shape_cast %28 : vector<16x1xf32> to vector<1x16x1xf32>
    tpu.vector_store %arg7[%c0_24, %c0_25, %c0_26], %31 {strides = array<i32>} : memref<1x16x1xf32, #tpu.memory_space<vmem>>, vector<1x16x1xf32>,
    %cst_27 = arith.constant dense<0xFF800000> : vector<128xf32>
    %32 = vector.multi_reduction <maximumf>, %5, %cst_27 [0] : vector<16x128xf32> to vector<128xf32>
    %33 = vector.shape_cast %32 : vector<128xf32> to vector<1x128xf32>
    %34 = vector.broadcast %33 : vector<1x128xf32> to vector<16x128xf32>
    %35 = arith.cmpf oeq, %5, %34 : vector<16x128xf32>
    %cst_28 = arith.constant 1.000000e+30 : f32
    %36 = vector.broadcast %cst_28 : f32 to vector<16x128xf32>
    %37 = arith.select %35, %8, %36 : vector<16x128xi1>, vector<16x128xf32>
    %cst_29 = arith.constant dense<0x7F800000> : vector<128xf32>
    %38 = vector.multi_reduction <minimumf>, %37, %cst_29 [0] : vector<16x128xf32> to vector<128xf32>
    %39 = vector.shape_cast %38 : vector<128xf32> to vector<1x128xf32>
    %cst_30 = arith.constant 4.900000e-01 : f32
    %40 = vector.broadcast %cst_30 : f32 to vector<1x128xf32>
    %41 = arith.cmpf olt, %39, %40 : vector<1x128xf32>
    %42 = arith.extui %41 : vector<1x128xi1> to vector<1x128xi32>
    %43 = arith.sitofp %42 : vector<1x128xi32> to vector<1x128xf32>
    %c0_31 = arith.constant 0 : index
    %c0_32 = arith.constant 0 : index
    %44 = vector.load %arg6[%c0_31, %c0_32] : memref<1x128xf32, #tpu.memory_space<vmem>>, vector<1x128xf32>
    %45 = math.log %44 : vector<1x128xf32>
    %cst_33 = arith.constant -1.000000e+02 : f32
    %46 = vector.broadcast %cst_33 : f32 to vector<1x128xf32>
    %47 = arith.maximumf %45, %46 : vector<1x128xf32>
    %cst_34 = arith.constant 1.000000e+00 : f32
    %48 = vector.broadcast %cst_34 : f32 to vector<1x128xf32>
    %49 = arith.subf %48, %44 : vector<1x128xf32>
    %50 = math.log %49 : vector<1x128xf32>
    %cst_35 = arith.constant -1.000000e+02 : f32
    %51 = vector.broadcast %cst_35 : f32 to vector<1x128xf32>
    %52 = arith.maximumf %50, %51 : vector<1x128xf32>
    %53 = arith.mulf %43, %47 : vector<1x128xf32>
    %cst_36 = arith.constant 1.000000e+00 : f32
    %54 = vector.broadcast %cst_36 : f32 to vector<1x128xf32>
    %55 = arith.subf %54, %43 : vector<1x128xf32>
    %56 = arith.mulf %55, %52 : vector<1x128xf32>
    %57 = arith.addf %53, %56 : vector<1x128xf32>
    %cst_37 = arith.constant 0.000000e+00 : f32
    %58 = vector.broadcast %cst_37 : f32 to vector<1x128xf32>
    %59 = arith.subf %58, %57 : vector<1x128xf32>
    %cst_38 = arith.constant 5.000000e-01 : f32
    %60 = vector.broadcast %cst_38 : f32 to vector<1x128xf32>
    %61 = arith.cmpf ogt, %44, %60 : vector<1x128xf32>
    %cst_39 = arith.constant 0.000000e+00 : f32
    %62 = vector.broadcast %cst_39 : f32 to vector<1x128xf32>
    %63 = arith.select %61, %43, %62 : vector<1x128xi1>, vector<1x128xf32>
    %64 = arith.mulf %43, %59 : vector<1x128xf32>
    %cst_40 = arith.constant 0.000000e+00 : f32
    %65 = vector.broadcast %cst_40 : f32 to vector<4x128xf32>
    %66 = tpu.concatenate %43, %59, %64, %63, %65 in 0 : vector<1x128xf32>, vector<1x128xf32>, vector<1x128xf32>, vector<1x128xf32>, vector<4x128xf32> -> vector<8x128xf32>
    %c0_41 = arith.constant 0 : index
    %c0_42 = arith.constant 0 : index
    %c0_43 = arith.constant 0 : index
    %67 = vector.load %arg9[%c0_41, %c0_42, %c0_43] : memref<1x8x128xf32, #tpu.memory_space<vmem>>, vector<1x8x128xf32>
    %68 = vector.shape_cast %67 : vector<1x8x128xf32> to vector<8x128xf32>
    %69 = arith.addf %68, %66 : vector<8x128xf32>
    %c0_44 = arith.constant 0 : index
    %c0_45 = arith.constant 0 : index
    %c0_46 = arith.constant 0 : index
    %70 = vector.load %arg9[%c0_44, %c0_45, %c0_46] : memref<1x8x128xf32, #tpu.memory_space<vmem>>, vector<1x8x128xf32>
    %71 = vector.shape_cast %70 : vector<1x8x128xf32> to vector<8x128xf32>
    %72 = vector.shape_cast %69 : vector<8x128xf32> to vector<1x8x128xf32>
    tpu.vector_store %arg9[%c0_44, %c0_45, %c0_46], %72 {strides = array<i32>} : memref<1x8x128xf32, #tpu.memory_space<vmem>>, vector<1x8x128xf32>,
    return
  }
  func.func @transform_0(%arg0: i32, %arg1: i32) -> (i32, i32) {
    %c0_i32 = arith.constant 0 : i32
    %c0_i32_0 = arith.constant 0 : i32
    %c0_i32_1 = arith.constant 0 : i32
    return %c0_i32, %c0_i32_0 : i32, i32
  }
  func.func @transform_1(%arg0: i32, %arg1: i32) -> (i32, i32) {
    %c1_i32 = arith.constant 1 : i32
    %0 = arith.muli %arg0, %c1_i32 : i32
    %1 = arith.addi %0, %arg1 : i32
    %c0_i32 = arith.constant 0 : i32
    %c0_i32_0 = arith.constant 0 : i32
    return %1, %c0_i32 : i32, i32
  }
  func.func @transform_2(%arg0: i32, %arg1: i32) -> (i32, i32) {
    %c0_i32 = arith.constant 0 : i32
    %c0_i32_0 = arith.constant 0 : i32
    %c0_i32_1 = arith.constant 0 : i32
    return %c0_i32, %c0_i32_0 : i32, i32
  }
  func.func @transform_3(%arg0: i32, %arg1: i32) -> (i32, i32) {
    %c1_i32 = arith.constant 1 : i32
    %0 = arith.muli %arg0, %c1_i32 : i32
    %1 = arith.addi %0, %arg1 : i32
    %c0_i32 = arith.constant 0 : i32
    %c0_i32_0 = arith.constant 0 : i32
    return %c0_i32, %1 : i32, i32
  }
  func.func @transform_4(%arg0: i32, %arg1: i32) -> (i32, i32) {
    %c1_i32 = arith.constant 1 : i32
    %0 = arith.muli %arg0, %c1_i32 : i32
    %1 = arith.addi %0, %arg1 : i32
    %c0_i32 = arith.constant 0 : i32
    %c0_i32_0 = arith.constant 0 : i32
    return %c0_i32, %1 : i32, i32
  }
  func.func @transform_5(%arg0: i32, %arg1: i32) -> (i32, i32, i32) {
    %c0_i32 = arith.constant 0 : i32
    %c0_i32_0 = arith.constant 0 : i32
    %c0_i32_1 = arith.constant 0 : i32
    return %arg0, %c0_i32, %c0_i32_0 : i32, i32, i32
  }
  func.func @transform_6(%arg0: i32, %arg1: i32) -> (i32, i32, i32) {
    %c0_i32 = arith.constant 0 : i32
    %c0_i32_0 = arith.constant 0 : i32
    %c0_i32_1 = arith.constant 0 : i32
    return %arg0, %c0_i32, %c0_i32_0 : i32, i32, i32
  }
  func.func @transform_7(%arg0: i32, %arg1: i32) -> (i32, i32, i32) {
    %c0_i32 = arith.constant 0 : i32
    %c0_i32_0 = arith.constant 0 : i32
    %c0_i32_1 = arith.constant 0 : i32
    return %arg0, %c0_i32, %c0_i32_0 : i32, i32, i32
  }
}

</mosaic_0001>

<bundles_post_ra>
// kernel: tpu_custom_call.1
= control target key start
LH: loop header
LB: loop body
LE: loop exit
PB: predicated region body
PF: predicated region fallthrough
CT: control target
= control target key end

     0   :  { %v985_v1 = vmov 0.0   ;;  %vm151_vm0 = vcmask 277504   ;;  %vm223_vm1 = vcmask 64512   ;;  %vm986_vm2 = vmmov 0   ;;  %s1168_s0 = inlined_call_operand.vmem [shape: bf16[16,34], index: 0, kind: input, shape index: {}]   ;;  %s1169_s1 = inlined_call_operand.vmem [shape: bf16[128,34], index: 1, kind: input, shape index: {}]   ;;  %s1170_s2 = inlined_call_operand.vmem [shape: f32[16,8], index: 2, kind: input, shape index: {}]   ;;  %s1171_s3 = inlined_call_operand.vmem [shape: f32[8,128], index: 3, kind: input, shape index: {}]   ;;  %s1172_s4 = inlined_call_operand.vmem [shape: f32[1,128], index: 4, kind: input, shape index: {}]   ;;  %s1173_s5 = inlined_call_operand.vmem [shape: f32[1,16,1], index: 5, kind: output, shape index: {0}]   ;;  %s1174_s6 = inlined_call_operand.vmem [shape: f32[1,16,1], index: 6, kind: output, shape index: {1}]   ;;  %s1175_s7 = inlined_call_operand.hbm [shape: f32[1,8,128], index: 7, kind: output, shape index: {2}]  }
   0x1   :  { %v948_v0 = vld [vmem:[%s1169_s1] sm:$0xff]   ;;  %883 = vmatprep.subr.bf16.mxu0 %v985_v1  ;;  %v949_v3 = vld [vmem:[%s1169_s1 + $0x8] sm:$0xff]   ;;  %899 = vmatprep.mubr.msk.bf16.mxu0 %vm986_vm2, %v985_v1 }
   0x2   :  { %v156_v2 = vsel %vm151_vm0, %v948_v0, 0  ;;  %v222_v4 = vld [vmem:[%s1171_s3] sm:$0xff]  ;;  %v221_v6 = vld [vmem:[%s1170_s2 + $0x8] sm:$0xff]  ;;  %v159_v10 = vsel %vm151_vm0, %v949_v3, 0 }
   0x3   :  { %884 = vmatpush3.bf16.xpose.msra.mxu0 %v156_v2  ;;  %v220_v5 = vld [vmem:[%s1170_s2] sm:$0xff]  ;;  %v231_v7 = vand.u32 4294901760, %v222_v4  ;;  %v228_v9 = vsel %vm223_vm1, %v221_v6, 0 }
   0x4   :  { %885 = vmatprep.subr.bf16.mxu0 %v985_v1  ;;  %v225_v8 = vsel %vm223_vm1, %v220_v5, 0  ;;  %v306_v12 = vand.u32 4294901760, %v228_v9 }
   0x5   :  { %v296_v11 = vand.u32 4294901760, %v225_v8  ;;  %903 = vmatprep.subr.mxu1 %v231_v7  ;;  %v318_v13 = vsub.f32 %v222_v4, %v231_v7 }
   0x6   :  { %904 = vmatpush3.msra.mxu1 %v231_v7  ;;  %v307_v15 = vsub.f32 %v228_v9, %v306_v12 }
   0x7   :  { %v297_v14 = vsub.f32 %v225_v8, %v296_v11  ;;  %v319_v16 = vand.u32 4294901760, %v318_v13 }
   0x8   :  { %v308_v18 = vand.u32 4294901760, %v307_v15 }
   0x9   :  { %v298_v17 = vand.u32 4294901760, %v297_v14 }
   0xb   :  { %886 = vmatpush3.bf16.xpose.msra.mxu0 %v159_v10 }
   0xc   :  { %13 = vsyncpa [#allocation3], 0  ;;  %887 = vmatprep.subr.bf16.mxu0 %v985_v1  ;;  %v950_v19 = vld [vmem:[%s1169_s1 + $0x10] sm:$0xff]   ;;  %v320_v20 = vsub.f32 %v318_v13, %v319_v16  ;;  %v299_v21 = vsub.f32 %v297_v14, %v298_v17  ;;  %v309_v22 = vsub.f32 %v307_v15, %v308_v18  ;;  %v951_v27 = vld [vmem:[%s1169_s1 + $0x18] sm:$0xff]   ;;  %vm82_vm3 = vcmask 7168   ;;  %s989_s13 = smov [#allocation2]  }
   0xd   :  { %v162_v26 = vsel %vm151_vm0, %v950_v19, 0  ;;  %v165_v28 = vsel %vm151_vm0, %v951_v27, 0  ;;  %v952_v29 = vld [vmem:[%s1169_s1 + $0x20] sm:$0xff]   ;;  %v953_v31 = vld [vmem:[%s1169_s1 + $0x28] sm:$0xff]   ;;  %v954_v33 = vld [vmem:[%s1169_s1 + $0x30] sm:$0xff]   ;;  %vm797_vm8 = vcmask 1040384  }
   0xe   :  { %v321_v23 = vand.u32 4294901760, %v320_v20  ;;  %v300_v24 = vand.u32 4294901760, %v299_v21  ;;  %v310_v25 = vand.u32 4294901760, %v309_v22  ;;  %v168_v30 = vsel %vm151_vm0, %v952_v29, 0  ;;  %v955_v35 = vld [vmem:[%s1169_s1 + $0x38] sm:$0xff]   ;;  %v956_v37 = vld [vmem:[%s1168_s0] sm:$0xff]  }
   0xf   :  { %v171_v32 = vsel %vm151_vm0, %v953_v31, 0  ;;  %v174_v34 = vsel %vm151_vm0, %v954_v33, 0  ;;  %v177_v36 = vsel %vm151_vm0, %v955_v35, 0  ;;  %v987_v47 = vmov -3e+38   ;;  %s818_s14 = sshll.u32 %s989_s13, 4  ;;  %s819_s14 = int_to_ptr.vmem [resolvable:$true] %s818_s14 }
  0x10   :  { %908 = vmatprep.subr.mxu1 %v321_v23  ;;  %905 = vmatprep.mubr.f32.mxu1 %v300_v24  ;;  %83 = vst.msk [vmem:[%s1173_s5] sm:$0xff] %vm82_vm3, %v987_v47  ;;  %84 = vst.msk [vmem:[%s1173_s5 + $0x8] sm:$0xff] %vm82_vm3, %v987_v47  ;;  %v769_v49 = vld [vmem:[%s1172_s4] sm:$0x1]  ;;  %vm799_vm9 = vcmask 1041408   ;;  %vm801_vm10 = vcmask 1042432   ;;  %p966_p1 = scmp.lt.s32.totalorder %s819_s14, %s819_s14 }
  0x11   :  { %906 = vmatmul.mubr.f32.vlgmr.msra.gmra.mrb[0].mxu1 %v310_v25  ;;  %v773_v51 = vsub.f32 1.0, %v769_v49  ;;  %957 = vlog2.f32 %v769_v49  ;;  %vm782_vm7 = vcmp.gt.f32.partialorder %v769_v49, 0.5  ;;  %vm803_vm11 = vcmask 1043456   ;;  %s961_s15 = scalar_lea.vmem %s819_s14, 128 }
  0x12   :  { %909 = vmatpush3.msra.mxu1 %v321_v23  ;;  %910 = vmatprep.mubr.f32.mxu1 %v296_v11  ;;  %v988_v31 = vmov 1e+30   ;;  %p962_p0 = scmp.ne.s32.totalorder %s819_s14, %s961_s15  ;;  %p967_p2 = scmp.lt.s32.totalorder %s961_s15, %s961_s15 }
  0x13   :  { %888 = vmatpush3.bf16.xpose.msra.mxu0 %v162_v26  ;;  %913 = vmatprep.subr.mxu1 %v318_v13  ;;  %959 = vlog2.f32 %v773_v51  ;;  %85 = vst.msk [vmem:[%s1174_s6] sm:$0xff] %vm82_vm3, %v988_v31  ;;  %86 = vst.msk [vmem:[%s1174_s6 + $0x8] sm:$0xff] %vm82_vm3, %v988_v31 }
  0x14   :  { %889 = vmatprep.subr.bf16.mxu0 %v985_v1  ;;  %p968_p3 = por %p967_p2, %p966_p1 }
  0x16   :  { %p969_p4 = pnand %p968_p3, %p962_p0 }
  0x17   :  { %v731_v23 = vld [vmem:[%s1173_s5] sm:$0xff]  ;;  %v732_v27 = vld [vmem:[%s1173_s5 + $0x8] sm:$0xff] }
  0x19   :  { %911 = vmatmul.mubr.f32.vlgmr.msra.gmra.mrb[0].mxu1 %v306_v12 }
  0x1a   :  { %914 = vmatpush3.msra.mxu1 %v318_v13  ;;  %915 = vmatprep.mubr.f32.mxu1 %v297_v14 }
  0x1b   :  { %890 = vmatpush3.bf16.xpose.msra.mxu0 %v165_v28  ;;  %918 = vmatprep.subr.mxu1 %v231_v7  ;;  %v958_v59 = vpop.eup %957 }
  0x1c   :  { %891 = vmatprep.subr.bf16.mxu0 %v985_v1  ;;  %v771_v0 = vmul.f32 0.6931472, %v958_v59 }
  0x1d   :  { %v960_v61 = vpop.eup %959 }
  0x1e   :  { %v775_v2 = vmul.f32 0.6931472, %v960_v61  ;;  %v772_v4 = vmax.f32 %v771_v0, -100.0 }
  0x20   :  { %v776_v5 = vmax.f32 %v775_v2, -100.0 }
  0x21   :  { %916 = vmatmul.mubr.f32.vlgmr.msra.gmra.mrb[0].mxu1 %v307_v15 }
  0x22   :  { %919 = vmatpush3.msra.mxu1 %v231_v7  ;;  %920 = vmatprep.mubr.f32.mxu1 %v298_v17 }
  0x23   :  { %892 = vmatpush3.bf16.xpose.msra.mxu0 %v168_v30  ;;  %923 = vmatprep.subr.mxu1 %v319_v16 }
  0x24   :  { %893 = vmatprep.subr.bf16.mxu0 %v985_v1 }
  0x29   :  { %921 = vmatmul.mubr.f32.vlgmr.msra.gmra.mrb[0].mxu1 %v308_v18 }
  0x2a   :  { %924 = vmatpush3.msra.mxu1 %v319_v16  ;;  %925 = vmatprep.mubr.f32.mxu1 %v296_v11 }
  0x2b   :  { %894 = vmatpush3.bf16.xpose.msra.mxu0 %v171_v32  ;;  %928 = vmatprep.subr.mxu1 %v231_v7 }
  0x2c   :  { %895 = vmatprep.subr.bf16.mxu0 %v985_v1 }
  0x31   :  { %926 = vmatmul.mubr.f32.vlgmr.msra.gmra.mrb[0].mxu1 %v306_v12 }
  0x32   :  { %929 = vmatpush3.msra.mxu1 %v231_v7  ;;  %930 = vmatprep.mubr.f32.mxu1 %v296_v11  ;;  %v792_v7 = vlaneseq }
  0x33   :  { %896 = vmatpush3.bf16.xpose.msra.mxu0 %v174_v34 }
  0x34   :  { %897 = vmatprep.subr.bf16.mxu0 %v985_v1  ;;  %v793_v11 = vshrl.u32 %v792_v7, 7 }
  0x36   :  { %v794_v14 = vsub.s32 0, %v793_v11 }
  0x39   :  { %931 = vmatmul.mubr.f32.vlgmr.msra.gmra.mrb[0].mxu1 %v306_v12 }
  0x3b   :  { %898 = vmatpush3.bf16.xpose.msra.mxu0 %v177_v36 }
  0x42   :  { %900 = vmatmul.mubr.msk.bf16.vlgmr.msra.gmra.mrb[0].mxu0 %vm151_vm0, %v956_v37 }
 0x10c   :  { %v1084_v38 = vpop.f32.mrb[0].mxu1 }
 0x10d   :  { %v1086_v39 = vpop.f32.mrb[1].mxu1 }
 0x115   :  { %v1088_v40 = vpop.f32.mrb[0].mxu0 }
 0x116   :  { %719 = vmax.xlane.f32.xlu0 %v1088_v40  ;;  %v901_v41 = vpop.f32.mrb[1].mxu0 }
 0x117   :  { %v1091_v42 = vpop.f32.mrb[2].mxu0 }
 0x118   :  { %v748_v43 = vmax.f32 %v1088_v40, %v1091_v42  ;;  %v902_v44 = vpop.f32.mrb[3].mxu0 }
 0x11a   :  { %v749_v45 = vrot.slane %v748_v43, 4  ;;  %721 = vmax.xlane.f32.xlu0 %v1091_v42 }
 0x11c   :  { %v750_v46 = vmax.f32 %v748_v43, %v749_v45 }
 0x11e   :  { %v751_v48 = vrot.slane %v750_v46, 2 }
 0x120   :  { %v752_v50 = vmax.f32 %v750_v46, %v751_v48 }
 0x122   :  { %v753_v52 = vrot.slane %v752_v50, 1 }
 0x124   :  { %v754_v53 = vmax.f32 %v752_v50, %v753_v52 }
 0x126   :  { %vm756_vm4 = vcmp.eq.f32.partialorder %v1091_v42, %v754_v53  ;;  %vm755_vm5 = vcmp.eq.f32.partialorder %v1088_v40, %v754_v53 }
 0x127   :  { %v758_v54 = vsel %vm756_vm4, %v1084_v38, 1e+30  ;;  %v757_v55 = vsel %vm755_vm5, %v1086_v39, 1e+30 }
 0x128   :  { %v759_v56 = vmin.f32 %v757_v55, %v758_v54 }
 0x12a   :  { %v760_v57 = vrot.slane %v759_v56, 4 }
 0x12c   :  { %v761_v58 = vmin.f32 %v759_v56, %v760_v57 }
 0x12e   :  { %v762_v60 = vrot.slane %v761_v58, 2 }
 0x130   :  { %v763_v62 = vmin.f32 %v761_v58, %v762_v60 }
 0x132   :  { %v764_v63 = vrot.slane %v763_v62, 1 }
 0x134   :  { %v765_v3 = vmin.f32 %v763_v62, %v764_v63 }
 0x136   :  { %vm766_vm6 = vcmp.lt.f32.partialorder %v765_v3, 0.49 }
 0x137   :  { %v855_v6 = vsel %vm766_vm6, 1.0, %v985_v1 }
 0x138   :  { %v778_v8 = vsub.f32 1.0, %v855_v6  ;;  %v777_v9 = vmul.f32 %v855_v6, %v772_v4  ;;  %v783_v15 = vsel %vm782_vm7, %v855_v6, 0.0 }
 0x139   :  { %v795_v20 = vrot.slane %v783_v15, %v794_v14 }
 0x13a   :  { %v779_v10 = vmul.f32 %v778_v8, %v776_v5 }
 0x13c   :  { %v780_v12 = vadd.f32 %v779_v10, %v777_v9 }
 0x13e   :  { %v781_v13 = vsub.f32 0.0, %v780_v12 }
 0x140   :  { %v784_v16 = vmul.f32 %v855_v6, %v781_v13  ;;  %v786_v17 = vrot.slane %v781_v13, 7 }
 0x142   :  { %v789_v18 = vrot.slane %v784_v16, 6  ;;  %v798_v19 = vsel %vm797_vm8, %v855_v6, %v786_v17 }
 0x144   :  { %v800_v1 = vsel %vm799_vm9, %v798_v19, %v789_v18 }
 0x145   :  { %v802_v21 = vsel %vm801_vm10, %v800_v1, %v795_v20 }
 0x146   :  { %v804_v22 = vsel %vm803_vm11, %v802_v21, 0.0 }
 0x147   :  { %807 = vst [vmem:[#allocation2] sm:$0xff] %v804_v22 }
 0x1a3   :  { %v720_v24 = vpop.xlane.xlu0 %719 }
 0x1a4   :  { %vm733_vm12 = vcmp.gt.f32.partialorder %v720_v24, %v731_v23  ;;  %vm723_vm13 = vcmp.eq.f32.partialorder %v1088_v40, %v720_v24 }
 0x1a5   :  { %v744_v25 = vsel %vm733_vm12, %v720_v24, %v731_v23  ;;  %v725_v26 = vsel %vm723_vm13, %v1086_v39, 1e+30 }
 0x1a6   :  { %746 = vst.msk [vmem:[%s1173_s5] sm:$0xff] %vm82_vm3, %v744_v25  ;;  %727 = vmin.xlane.f32.xlu1 %v725_v26 }
 0x1a7   :  { %v722_v28 = vpop.xlane.xlu0 %721 }
 0x1a8   :  { %vm734_vm14 = vcmp.gt.f32.partialorder %v722_v28, %v732_v27  ;;  %vm724_vm15 = vcmp.eq.f32.partialorder %v1091_v42, %v722_v28 }
 0x1a9   :  { %v745_v29 = vsel %vm734_vm14, %v722_v28, %v732_v27  ;;  %v726_v30 = vsel %vm724_vm15, %v1084_v38, 1e+30 }
 0x1aa   :  { %747 = vst.msk [vmem:[%s1173_s5 + $0x8] sm:$0xff] %vm82_vm3, %v745_v29  ;;  %729 = vmin.xlane.f32.xlu1 %v726_v30 }
 0x1ab   :  { %972 = shalt.err (!%p969_p4)
}
 0x1ac   :  { %s973_s17 = scalar_lea.hbm %s1175_s7, 128 }
 0x1ad   :  { %p974_p5 = scmp.ne.s32.totalorder %s1175_s7, %s973_s17  ;;  %p977_p6 = scmp.lt.u32.totalorder %s973_s17, %s1175_s7 }
 0x1af   :  { %p979_p7 = pnand %p977_p6, %p974_p5 }
 0x1b1   :  { %982 = shalt.err (!%p979_p7)
}
 0x1b2   :  { %821 = dma.vmem_to_hbm [thread:$0]  %s819_s14, 128, %s1175_s7, [#allocation3]   ;;  %v735_v32 = vld [vmem:[%s1174_s6] sm:$0xff]  ;;  %v736_v35 = vld [vmem:[%s1174_s6 + $0x8] sm:$0xff] }
 0x233   :  { %v728_v33 = vpop.xlane.xlu1 %727 }
 0x234   :  { %v737_v34 = vsel %vm733_vm12, %v728_v33, %v735_v32 }
 0x235   :  { %740 = vst.msk [vmem:[%s1174_s6] sm:$0xff] %vm82_vm3, %v737_v34 }
 0x237   :  { %v730_v36 = vpop.xlane.xlu1 %729 }
 0x238   :  { %v738_v37 = vsel %vm734_vm14, %v730_v36, %v736_v35 }
 0x239   :  { %741 = vst.msk [vmem:[%s1174_s6 + $0x8] sm:$0xff] %vm82_vm3, %v738_v37 }
 0x23a   :  { %983 = dma.done.wait [#allocation3], 128  }
 0x23b   :  { %984 = vsyncadd [#allocation3], 4294967168 }
 0x23c   :  { %829 = vsyncpa [#allocation3], 1 }

</bundles_post_ra>
